<compile_context>
chip_gen: v7x
topology: tpu7x:2x2x1
jax: 0.10.0
libtpu: 0.0.40
codegen_flags: <defaults>
</compile_context>

<pallas_src>
import jax
import jax.numpy as jnp
from jax.experimental import pallas as pl
from jax.experimental.pallas import tpu as pltpu


def _attn_pool_kernel(x_ref, wt_ref, b_ref, o_ref):
    # x_ref:  (TB, emb_num*emb_dim)       flattened inputs (single streamed copy)
    # wt_ref: (emb_num*emb_dim, emb_num)  projection weight, pre-transposed, f32
    # b_ref:  (1, emb_num)                projection bias, f32
    # o_ref:  (TB, emb_dim)
    emb_num = wt_ref.shape[1]
    emb_dim = o_ref.shape[1]

    x = x_ref[...]

    # energy = x_flat @ W^T + b   -> (TB, emb_num)   (MXU, f32 accumulation)
    energy = jnp.dot(x, wt_ref[...], preferred_element_type=jnp.float32)
    energy = energy + b_ref[...]

    # numerically stable softmax over emb_num (exact reciprocal -- EUP slot is idle anyway)
    m = jnp.max(energy, axis=1, keepdims=True)
    e = jnp.exp(energy - m)
    w = e * pl.reciprocal(jnp.sum(e, axis=1, keepdims=True))

    # weighted sum over emb_num as an unrolled MAC over static lane slices of x.
    # w is f32, so the accumulator stays f32 regardless of the input dtype.
    acc = w[:, 0:1] * x[:, 0:emb_dim]
    for n in range(1, emb_num):
        acc = acc + w[:, n:n + 1] * x[:, n * emb_dim:(n + 1) * emb_dim]

    o_ref[...] = acc.astype(o_ref.dtype)


def _tile_vmem_bytes(tile_b, flat_dim, emb_num, emb_dim, in_itemsize, out_itemsize,
                     w_itemsize=4):
    """Upper-bound VMEM footprint of one pipelined grid step.

    x / out blocks are double-buffered by the pipeline; weight / bias blocks are
    single-buffered (pipeline_mode=pl.Buffered(1), constant index_map)."""
    pad_l = lambda c: ((c + 127) // 128) * 128
    pad_s = lambda r: ((r + 7) // 8) * 8
    x_buf = 2 * pad_s(tile_b) * pad_l(flat_dim) * in_itemsize
    o_buf = 2 * pad_s(tile_b) * pad_l(emb_dim) * out_itemsize
    w_buf = 1 * pad_s(flat_dim) * pad_l(emb_num) * w_itemsize
    b_buf = 1 * pad_s(1) * pad_l(emb_num) * 4
    return x_buf + o_buf + w_buf + b_buf


def _vmem_policy():
    """Generation-aware VMEM policy: (tile budget, scoped-limit floor/cap, x-bytes/step)."""
    try:
        cap = pltpu.get_tpu_info().vmem_capacity_bytes
    except Exception:  # be conservative if the query is unavailable
        cap = 64 * 2**20
    if cap >= 100 * 2**20:
        # v5e / v6e class: 128 MiB physical VMEM -> big tiles, high scoped limit.
        return dict(budget=56 * 2**20, limit_floor=16 * 2**20, limit_cap=96 * 2**20,
                    x_bytes_target=8 * 2**20)
    # v7x class: 64 MiB physical VMEM per TensorCore -> leave headroom for compiler scratch.
    return dict(budget=28 * 2**20, limit_floor=16 * 2**20, limit_cap=38 * 2**20,
                x_bytes_target=4 * 2**20)


def _pick_tile_b(B, flat_dim, emb_num, emb_dim, in_itemsize, out_itemsize,
                 vmem_budget_bytes, x_bytes_target):
    """Batch tile sized by bytes-per-step, sublane-aligned, within the VMEM budget."""
    sub = {4: 8, 2: 16, 1: 32}.get(in_itemsize, 8)
    bytes_per_row = flat_dim * in_itemsize
    total_x_bytes = B * bytes_per_row

    # Grid-step count from the per-step byte target (fewer, bigger steps when x is small).
    steps = max(1, total_x_bytes // x_bytes_target)
    # Prefer >=4 steps when each step still carries >= ~1 MiB of x (keeps the pipeline
    # busy and gives each v7x TensorCore >=2 steps to overlap DMA with compute).
    if total_x_bytes >= 4 * (1 << 20):
        steps = max(steps, 4)
    # Even step count so the two v7x TensorCores stay balanced under 'parallel' sharding.
    if steps >= 2 and steps % 2 == 1:
        steps += 1

    t = -(-B // steps)                              # ceil div
    t = ((t + sub - 1) // sub) * sub                # round up to sublane multiple
    t = max(sub, min(t, ((B + sub - 1) // sub) * sub))

    # Shrink until the per-step footprint fits the generation-aware VMEM budget.
    while t > sub and _tile_vmem_bytes(t, flat_dim, emb_num, emb_dim,
                                       in_itemsize, out_itemsize) > vmem_budget_bytes:
        t -= sub
    return t


def attention_pooling2(x, weight, bias, *, tile_b=None):
    """AttentionPooling2 forward.

    x:      (B, emb_num, emb_dim)
    weight: (emb_num, emb_num*emb_dim)   (torch nn.Linear layout)
    bias:   (emb_num,)
    returns (B, emb_dim)
    """
    B, emb_num, emb_dim = x.shape
    flat_dim = emb_num * emb_dim
    assert weight.shape == (emb_num, flat_dim)
    assert bias.shape == (emb_num,)

    in_itemsize = jnp.dtype(x.dtype).itemsize
    policy = _vmem_policy()
    if tile_b is None:
        tile_b = _pick_tile_b(B, flat_dim, emb_num, emb_dim, in_itemsize, in_itemsize,
                              policy["budget"], policy["x_bytes_target"])

    # Pad B up to a tile multiple (zero rows; sliced off below).  Keeps every grid step a
    # legal (8,128)-aligned block even for odd batch sizes.
    x_flat = x.reshape(B, flat_dim)                       # single streamed input copy
    B_pad = -(-B // tile_b) * tile_b
    if B_pad != B:
        x_flat = jnp.pad(x_flat, ((0, B_pad - B), (0, 0)))

    # Weight stays f32 (matches PyTorch f32 nn.Linear; MXU accumulates in f32 regardless).
    # If the weights are reused across many calls, pre-transpose them once at the call site.
    w_t = weight.astype(jnp.float32).T                    # (flat_dim, emb_num)
    b2 = bias.reshape(1, emb_num).astype(jnp.float32)

    grid = (B_pad // tile_b,)
    tile_bytes = _tile_vmem_bytes(tile_b, flat_dim, emb_num, emb_dim,
                                  in_itemsize, in_itemsize)
    # _tile_vmem_bytes already includes double buffering; ~1.5x is headroom for compiler
    # internal scratch, clamped to the generation-specific cap.
    vmem_limit = int(min(policy["limit_cap"],
                         max(policy["limit_floor"], int(1.5 * tile_bytes))))

    cost = pl.CostEstimate(
        flops=2 * B_pad * flat_dim * emb_num + 2 * B_pad * flat_dim,
        transcendentals=B_pad * emb_num,
        bytes_accessed=(B_pad * flat_dim * in_itemsize           # x read
                        + flat_dim * emb_num * 4 + emb_num * 4   # weight + bias
                        + B_pad * emb_dim * in_itemsize),        # output write
    )

    out = pl.pallas_call(
        _attn_pool_kernel,
        out_shape=jax.ShapeDtypeStruct((B_pad, emb_dim), x.dtype),
        grid_spec=pltpu.PrefetchScalarGridSpec(
            num_scalar_prefetch=0,
            grid=grid,
            in_specs=[
                pl.BlockSpec((tile_b, flat_dim), lambda i: (i, 0)),
                # Constant index_map -> fetched once; single-buffer to save VMEM.
                pl.BlockSpec((flat_dim, emb_num), lambda i: (0, 0),
                             pipeline_mode=pl.Buffered(1)),
                pl.BlockSpec((1, emb_num), lambda i: (0, 0),
                             pipeline_mode=pl.Buffered(1)),
            ],
            out_specs=pl.BlockSpec((tile_b, emb_dim), lambda i: (i, 0)),
        ),
        compiler_params=pltpu.CompilerParams(
            dimension_semantics=("parallel",),
            vmem_limit_bytes=vmem_limit,
        ),
        cost_estimate=cost,
    )(x_flat, w_t, b2)

    if B_pad != B:
        out = out[:B]
    return out


def attention_pooling2_ref(x, weight, bias):
    B = x.shape[0]
    energy = x.reshape(B, -1) @ weight.T + bias
    w = jax.nn.softmax(energy, axis=1)
    return jnp.sum(x * w[:, :, None], axis=1)


if __name__ == "__main__":
    # Small deterministic setup: batch=64, emb_num=4, emb_dim=32  (flat_dim = 128)
    B, emb_num, emb_dim = 64, 4, 32
    key = jax.random.PRNGKey(0)
    kx, kw, kb = jax.random.split(key, 3)

    x = jax.random.normal(kx, (B, emb_num, emb_dim), dtype=jnp.float32)
    # nn.Linear(emb_dim*emb_num, emb_num): weight (emb_num, emb_dim*emb_num), bias (emb_num,)
    fan_in = emb_dim * emb_num
    bound = 1.0 / (fan_in ** 0.5)
    weight = jax.random.uniform(kw, (emb_num, fan_in), dtype=jnp.float32,
                                minval=-bound, maxval=bound)
    bias = jax.random.uniform(kb, (emb_num,), dtype=jnp.float32,
                              minval=-bound, maxval=bound)

    out = attention_pooling2(x, weight, bias)
    out = jax.block_until_ready(out)

    ref = attention_pooling2_ref(x, weight, bias)
    assert out.shape == (B, emb_dim)
    assert jnp.allclose(out, ref, atol=1e-5, rtol=1e-5), "mismatch vs reference"

    print("KERNEL_OK")
</pallas_src>

<mosaic_0001>
module attributes {stable_mosaic.version = 11 : i64} {
  func.func @_attn_pool_kernel(%arg0: i32, %arg1: memref<64x128xf32, #tpu.memory_space<vmem>>, %arg2: memref<128x4xf32, #tpu.memory_space<vmem>>, %arg3: memref<1x4xf32, #tpu.memory_space<vmem>>, %arg4: memref<64x32xf32, #tpu.memory_space<vmem>>) attributes {dimension_semantics = [#tpu.dimension_semantics<parallel>], iteration_bounds = array<i64: 1>, scalar_prefetch = 0 : i64, scratch_operands = 0 : i64, tpu.core_type = #tpu.core_type<tc>, window_params = [{transform_indices = @transform_0, window_bounds = array<i64: 64, 128>}, {pipeline_mode = #tpu.pipeline_mode<synchronous>, transform_indices = @transform_1, window_bounds = array<i64: 128, 4>}, {pipeline_mode = #tpu.pipeline_mode<synchronous>, transform_indices = @transform_2, window_bounds = array<i64: 1, 4>}, {transform_indices = @transform_3, window_bounds = array<i64: 64, 32>}]} {
    %c0 = arith.constant 0 : index
    %c0_0 = arith.constant 0 : index
    %0 = vector.load %arg1[%c0, %c0_0] : memref<64x128xf32, #tpu.memory_space<vmem>>, vector<64x128xf32>
    %c0_1 = arith.constant 0 : index
    %c0_2 = arith.constant 0 : index
    %1 = vector.load %arg2[%c0_1, %c0_2] : memref<128x4xf32, #tpu.memory_space<vmem>>, vector<128x4xf32>
    %cst = arith.constant dense<0.000000e+00> : vector<64x4xf32>
    %2 = tpu.matmul %0, %1, %cst {dimension_numbers = #tpu.dot_dimension_numbers<[1], [0], [0], [1], [0, 0, 1, 1], [], []>} : vector<64x128xf32>, vector<128x4xf32>, vector<64x4xf32> -> vector<64x4xf32>
    %c0_3 = arith.constant 0 : index
    %c0_4 = arith.constant 0 : index
    %3 = vector.load %arg3[%c0_3, %c0_4] : memref<1x4xf32, #tpu.memory_space<vmem>>, vector<1x4xf32>
    %4 = vector.broadcast %3 : vector<1x4xf32> to vector<64x4xf32>
    %5 = arith.addf %2, %4 : vector<64x4xf32>
    %cst_5 = arith.constant dense<0xFF800000> : vector<64xf32>
    %6 = vector.multi_reduction <maximumf>, %5, %cst_5 [1] : vector<64x4xf32> to vector<64xf32>
    %7 = vector.shape_cast %6 : vector<64xf32> to vector<64x1xf32>
    %8 = vector.broadcast %7 : vector<64x1xf32> to vector<64x4xf32>
    %9 = arith.subf %5, %8 : vector<64x4xf32>
    %10 = math.exp %9 : vector<64x4xf32>
    %cst_6 = arith.constant dense<0.000000e+00> : vector<64xf32>
    %11 = vector.multi_reduction <add>, %10, %cst_6 [1] : vector<64x4xf32> to vector<64xf32>
    %12 = vector.shape_cast %11 : vector<64xf32> to vector<64x1xf32>
    %13 = tpu.reciprocal %12 : vector<64x1xf32> -> vector<64x1xf32>
    %14 = vector.broadcast %13 : vector<64x1xf32> to vector<64x4xf32>
    %15 = arith.mulf %10, %14 : vector<64x4xf32>
    %16 = vector.extract_strided_slice %15 {offsets = [0, 0], sizes = [64, 1], strides = [1, 1]} : vector<64x4xf32> to vector<64x1xf32>
    %17 = vector.extract_strided_slice %0 {offsets = [0, 0], sizes = [64, 32], strides = [1, 1]} : vector<64x128xf32> to vector<64x32xf32>
    %18 = vector.broadcast %16 : vector<64x1xf32> to vector<64x32xf32>
    %19 = arith.mulf %18, %17 : vector<64x32xf32>
    %20 = vector.extract_strided_slice %15 {offsets = [0, 1], sizes = [64, 1], strides = [1, 1]} : vector<64x4xf32> to vector<64x1xf32>
    %21 = vector.extract_strided_slice %0 {offsets = [0, 32], sizes = [64, 32], strides = [1, 1]} : vector<64x128xf32> to vector<64x32xf32>
    %22 = vector.broadcast %20 : vector<64x1xf32> to vector<64x32xf32>
    %23 = arith.mulf %22, %21 : vector<64x32xf32>
    %24 = arith.addf %19, %23 : vector<64x32xf32>
    %25 = vector.extract_strided_slice %15 {offsets = [0, 2], sizes = [64, 1], strides = [1, 1]} : vector<64x4xf32> to vector<64x1xf32>
    %26 = vector.extract_strided_slice %0 {offsets = [0, 64], sizes = [64, 32], strides = [1, 1]} : vector<64x128xf32> to vector<64x32xf32>
    %27 = vector.broadcast %25 : vector<64x1xf32> to vector<64x32xf32>
    %28 = arith.mulf %27, %26 : vector<64x32xf32>
    %29 = arith.addf %24, %28 : vector<64x32xf32>
    %30 = vector.extract_strided_slice %15 {offsets = [0, 3], sizes = [64, 1], strides = [1, 1]} : vector<64x4xf32> to vector<64x1xf32>
    %31 = vector.extract_strided_slice %0 {offsets = [0, 96], sizes = [64, 32], strides = [1, 1]} : vector<64x128xf32> to vector<64x32xf32>
    %32 = vector.broadcast %30 : vector<64x1xf32> to vector<64x32xf32>
    %33 = arith.mulf %32, %31 : vector<64x32xf32>
    %34 = arith.addf %29, %33 : vector<64x32xf32>
    %c0_7 = arith.constant 0 : index
    %c0_8 = arith.constant 0 : index
    %35 = vector.load %arg4[%c0_7, %c0_8] : memref<64x32xf32, #tpu.memory_space<vmem>>, vector<64x32xf32>
    tpu.vector_store %arg4[%c0_7, %c0_8], %34 {strides = array<i32>} : memref<64x32xf32, #tpu.memory_space<vmem>>, vector<64x32xf32>,
    return
  }
  func.func @transform_0(%arg0: i32) -> (i32, i32) {
    %c0_i32 = arith.constant 0 : i32
    %c0_i32_0 = arith.constant 0 : i32
    return %arg0, %c0_i32 : i32, i32
  }
  func.func @transform_1(%arg0: i32) -> (i32, i32) {
    %c0_i32 = arith.constant 0 : i32
    %c0_i32_0 = arith.constant 0 : i32
    %c0_i32_1 = arith.constant 0 : i32
    return %c0_i32, %c0_i32_0 : i32, i32
  }
  func.func @transform_2(%arg0: i32) -> (i32, i32) {
    %c0_i32 = arith.constant 0 : i32
    %c0_i32_0 = arith.constant 0 : i32
    %c0_i32_1 = arith.constant 0 : i32
    return %c0_i32, %c0_i32_0 : i32, i32
  }
  func.func @transform_3(%arg0: i32) -> (i32, i32) {
    %c0_i32 = arith.constant 0 : i32
    %c0_i32_0 = arith.constant 0 : i32
    return %arg0, %c0_i32 : i32, i32
  }
}

</mosaic_0001>

<bundles_post_ra>
// kernel: tpu_custom_call.1
= control target key start
LH: loop header
LB: loop body
LE: loop exit
PB: predicated region body
PF: predicated region fallthrough
CT: control target
= control target key end

     0   :  { %vm150_vm0 = vcmask 31744   ;;  %s727_s7 = smov 32   ;;  %vm527_vm1 = vcmask 261120   ;;  %s1016_s1 = inlined_call_operand.vmem [shape: f32[128,4], index: 1, kind: input, shape index: {}]   ;;  %s1017_s0 = inlined_call_operand.vmem [shape: f32[64,128], index: 0, kind: input, shape index: {}]   ;;  %s1018_s2 = inlined_call_operand.vmem [shape: f32[1,4], index: 2, kind: input, shape index: {}]   ;;  %s1019_s3 = inlined_call_operand.vmem [shape: f32[64,32], index: 3, kind: output, shape index: {}]  }
   0x1   :  { %v22_v0 = vld [vmem:[%s1016_s1] sm:$0xff]  ;;  %v23_v1 = vld [vmem:[%s1016_s1 + $0x8] sm:$0xff]  ;;  %v24_v2 = vld [vmem:[%s1016_s1 + $0x10] sm:$0xff] }
   0x2   :  { %v609_v3 = vpack.c.bf16 %v23_v1, %v22_v0  ;;  %v25_v4 = vld [vmem:[%s1016_s1 + $0x18] sm:$0xff]  ;;  %v26_v6 = vld [vmem:[%s1016_s1 + $0x20] sm:$0xff]  ;;  %v27_v7 = vld [vmem:[%s1016_s1 + $0x28] sm:$0xff] }
   0x3   :  { %v613_v5 = vpack.c.bf16 %v25_v4, %v24_v2  ;;  %v617_v8 = vpack.c.bf16 %v27_v7, %v26_v6  ;;  %v769_v9 = vld [vmem:[%s1017_s0] sm:$0xff]  ;;  %v28_v11 = vld [vmem:[%s1016_s1 + $0x30] sm:$0xff]  ;;  %v29_v12 = vld [vmem:[%s1016_s1 + $0x38] sm:$0xff] }
   0x4   :  { %610 = vmatprep.subr.bf16.mxu0 %v609_v3  ;;  %641 = vmatprep.subr.bf16.mxu1 %v609_v3  ;;  %v774_v10 = vld [vmem:[%s1017_s0 + $0x20] sm:$0xff]  ;;  %v621_v13 = vpack.c.bf16 %v29_v12, %v28_v11  ;;  %v31_v15 = vld [vmem:[%s1016_s1 + $0x48] sm:$0xff]  ;;  %v32_v17 = vld [vmem:[%s1016_s1 + $0x50] sm:$0xff] }
   0x5   :  { %612 = vmatpush3.bf16.msra.mxu0 %v609_v3  ;;  %649 = vmatpush3.bf16.msra.mxu1 %v609_v3  ;;  %v30_v14 = vld [vmem:[%s1016_s1 + $0x40] sm:$0xff]  ;;  %v33_v18 = vld [vmem:[%s1016_s1 + $0x58] sm:$0xff]  ;;  %v35_v21 = vld [vmem:[%s1016_s1 + $0x68] sm:$0xff] }
   0x6   :  { %614 = vmatprep.subr.bf16.mxu0 %v613_v5  ;;  %642 = vmatprep.subr.bf16.mxu1 %v613_v5  ;;  %v625_v16 = vpack.c.bf16 %v31_v15, %v30_v14  ;;  %v629_v19 = vpack.c.bf16 %v33_v18, %v32_v17  ;;  %v34_v20 = vld [vmem:[%s1016_s1 + $0x60] sm:$0xff]  ;;  %v36_v23 = vld [vmem:[%s1016_s1 + $0x70] sm:$0xff]  ;;  %v37_v24 = vld [vmem:[%s1016_s1 + $0x78] sm:$0xff] }
   0x7   :  { %597 = vmatprep.mubr.f32.mxu0 %v769_v9  ;;  %603 = vmatprep.mubr.f32.mxu1 %v774_v10  ;;  %v633_v22 = vpack.c.bf16 %v35_v21, %v34_v20  ;;  %v637_v25 = vpack.c.bf16 %v37_v24, %v36_v23  ;;  %v811_v26 = vld [vmem:[%s1017_s0 + $0x8] sm:$0xff]  ;;  %v821_v28 = vld [vmem:[%s1017_s0 + $0x10] sm:$0xff]  ;;  %v834_v30 = vld [vmem:[%s1017_s0 + $0x18] sm:$0xff] }
   0x8   :  { %v816_v27 = vld [vmem:[%s1017_s0 + $0x28] sm:$0xff]  ;;  %v826_v29 = vld [vmem:[%s1017_s0 + $0x30] sm:$0xff]  ;;  %v840_v31 = vld [vmem:[%s1017_s0 + $0x38] sm:$0xff]  ;;  %s725_s0 = smov 96  }
   0x9   :  { %616 = vmatpush3.bf16.msra.mxu0 %v613_v5  ;;  %650 = vmatpush3.bf16.msra.mxu1 %v613_v5  ;;  %v540_v32 = vld [vmem:[%s1018_s2] ss:$0 sm:$0xff]  ;;  %s726_s2 = smov 64  }
   0xa   :  { %618 = vmatprep.subr.bf16.mxu0 %v617_v8  ;;  %643 = vmatprep.subr.bf16.mxu1 %v617_v8 }
   0xd   :  { %620 = vmatpush3.bf16.msra.mxu0 %v617_v8  ;;  %651 = vmatpush3.bf16.msra.mxu1 %v617_v8 }
   0xe   :  { %622 = vmatprep.subr.bf16.mxu0 %v621_v13  ;;  %644 = vmatprep.subr.bf16.mxu1 %v621_v13 }
  0x11   :  { %624 = vmatpush3.bf16.msra.mxu0 %v621_v13  ;;  %652 = vmatpush3.bf16.msra.mxu1 %v621_v13 }
  0x12   :  { %626 = vmatprep.subr.bf16.mxu0 %v625_v16  ;;  %645 = vmatprep.subr.bf16.mxu1 %v625_v16 }
  0x15   :  { %628 = vmatpush3.bf16.msra.mxu0 %v625_v16  ;;  %653 = vmatpush3.bf16.msra.mxu1 %v625_v16 }
  0x16   :  { %630 = vmatprep.subr.bf16.mxu0 %v629_v19  ;;  %646 = vmatprep.subr.bf16.mxu1 %v629_v19 }
  0x19   :  { %632 = vmatpush3.bf16.msra.mxu0 %v629_v19  ;;  %654 = vmatpush3.bf16.msra.mxu1 %v629_v19 }
  0x1a   :  { %634 = vmatprep.subr.bf16.mxu0 %v633_v22  ;;  %647 = vmatprep.subr.bf16.mxu1 %v633_v22 }
  0x1d   :  { %636 = vmatpush3.bf16.msra.mxu0 %v633_v22  ;;  %655 = vmatpush3.bf16.msra.mxu1 %v633_v22 }
  0x1e   :  { %638 = vmatprep.subr.bf16.mxu0 %v637_v25  ;;  %648 = vmatprep.subr.bf16.mxu1 %v637_v25 }
  0x21   :  { %640 = vmatpush3.bf16.msra.mxu0 %v637_v25  ;;  %656 = vmatpush3.bf16.msra.mxu1 %v637_v25 }
  0x24   :  { %598 = vmatmul.mubr.f32.vlgmr.msra.gmra.mrb[0].mxu0 %v811_v26  ;;  %604 = vmatmul.mubr.f32.vlgmr.msra.gmra.mrb[0].mxu1 %v816_v27 }
  0x25   :  { %600 = vmatprep.mubr.f32.mxu0 %v821_v28  ;;  %606 = vmatprep.mubr.f32.mxu1 %v826_v29 }
  0x28   :  { %601 = vmatmul.mubr.f32.gmra.mrb[2].mxu0 %v834_v30  ;;  %607 = vmatmul.mubr.f32.gmra.mrb[2].mxu1 %v840_v31 }
  0xf7   :  { %v599_v33 = vpop.f32.mrb[0].mxu0  ;;  %v605_v34 = vpop.f32.mrb[0].mxu1 }
  0xf8   :  { %v117_v35 = vadd.f32 %v599_v33, %v540_v32  ;;  %v137_v36 = vadd.f32 %v605_v34, %v540_v32  ;;  %v111_v37 = vpop.f32.mrb[1].mxu0  ;;  %v131_v38 = vpop.f32.mrb[1].mxu1 }
  0xf9   :  { %v112_v39 = vadd.f32 %v540_v32, %v111_v37  ;;  %v132_v48 = vadd.f32 %v540_v32, %v131_v38 }
  0xfa   :  { %v166_v40 = vsel %vm150_vm0, %v137_v36, -inf  ;;  %v154_v41 = vsel %vm150_vm0, %v117_v35, -inf }
  0xfb   :  { %167 = vmax.xlane.f32.xlu1 %v166_v40  ;;  %155 = vmax.xlane.f32.xlu0 %v154_v41  ;;  %v602_v42 = vpop.f32.mrb[2].mxu0  ;;  %v608_v43 = vpop.f32.mrb[2].mxu1  ;;  %v151_v50 = vsel %vm150_vm0, %v112_v39, -inf  ;;  %v163_v54 = vsel %vm150_vm0, %v132_v48, -inf  ;;  %v721_v41 = vmov 1  }
  0xfc   :  { %v127_v44 = vadd.f32 %v602_v42, %v540_v32  ;;  %v121_v45 = vpop.f32.mrb[3].mxu0  ;;  %v141_v46 = vpop.f32.mrb[3].mxu1  ;;  %v147_v51 = vadd.f32 %v608_v43, %v540_v32  ;;  %665 = vset.pattern.permute.xlu0 %v721_v41  ;;  %v722_v42 = vmov 0  }
  0xfd   :  { %v122_v47 = vadd.f32 %v540_v32, %v121_v45  ;;  %v142_v52 = vadd.f32 %v540_v32, %v141_v46  ;;  %664 = vset.pattern.permute.xlu1 %v722_v42 }
  0xfe   :  { %v160_v49 = vsel %vm150_vm0, %v127_v44, -inf  ;;  %v172_v55 = vsel %vm150_vm0, %v147_v51, -inf }
  0xff   :  { %161 = vmax.xlane.f32.xlu1 %v160_v49  ;;  %152 = vmax.xlane.f32.xlu0 %v151_v50  ;;  %v157_v53 = vsel %vm150_vm0, %v122_v47, -inf  ;;  %v169_v56 = vsel %vm150_vm0, %v142_v52, -inf }
 0x103   :  { %158 = vmax.xlane.f32.xlu1 %v157_v53  ;;  %164 = vmax.xlane.f32.xlu0 %v163_v54 }
 0x107   :  { %173 = vmax.xlane.f32.xlu1 %v172_v55  ;;  %170 = vmax.xlane.f32.xlu0 %v169_v56 }
 0x188   :  { %v168_v57 = vpop.xlane.xlu1 %167  ;;  %v156_v58 = vpop.xlane.xlu0 %155 }
 0x189   :  { %v180_v59 = vsub.f32 %v137_v36, %v168_v57  ;;  %v176_v60 = vsub.f32 %v117_v35, %v156_v58 }
 0x18b   :  { %v185_v61 = vmul.f32 1.442695, %v176_v60  ;;  %v193_v62 = vmul.f32 1.442695, %v180_v59 }
 0x18c   :  { %v162_v63 = vpop.xlane.xlu1 %161  ;;  %v153_v0 = vpop.xlane.xlu0 %152 }
 0x18d   :  { %v178_v1 = vsub.f32 %v127_v44, %v162_v63  ;;  %v175_v2 = vsub.f32 %v112_v39, %v153_v0  ;;  %689 = vpow2.f32 %v185_v61 }
 0x18e   :  { %691 = vpow2.f32 %v193_v62 }
 0x18f   :  { %v183_v3 = vmul.f32 1.442695, %v175_v2  ;;  %v189_v4 = vmul.f32 1.442695, %v178_v1 }
 0x190   :  { %v159_v5 = vpop.xlane.xlu1 %158  ;;  %v165_v6 = vpop.xlane.xlu0 %164 }
 0x191   :  { %v177_v7 = vsub.f32 %v122_v47, %v159_v5  ;;  %v179_v8 = vsub.f32 %v132_v48, %v165_v6  ;;  %693 = vpow2.f32 %v183_v3 }
 0x192   :  { %695 = vpow2.f32 %v189_v4 }
 0x193   :  { %v191_v11 = vmul.f32 1.442695, %v179_v8  ;;  %v187_v12 = vmul.f32 1.442695, %v177_v7 }
 0x194   :  { %v174_v13 = vpop.xlane.xlu1 %173  ;;  %v171_v14 = vpop.xlane.xlu0 %170 }
 0x195   :  { %v182_v15 = vsub.f32 %v147_v51, %v174_v13  ;;  %v181_v16 = vsub.f32 %v142_v52, %v171_v14  ;;  %697 = vpow2.f32 %v191_v11  ;;  %v723_v51 = vmov 2  }
 0x196   :  { %699 = vpow2.f32 %v187_v12  ;;  %v724_v52 = vmov 3  }
 0x197   :  { %v197_v17 = vmul.f32 1.442695, %v182_v15  ;;  %v690_v18 = vpop.eup %689  ;;  %v195_v19 = vmul.f32 1.442695, %v181_v16 }
 0x198   :  { %v202_v20 = vsel %vm150_vm0, %v690_v18, 0.0  ;;  %v692_v21 = vpop.eup %691 }
 0x199   :  { %701 = vpow2.f32 %v197_v17  ;;  %203 = vadd.xlane.f32.xlu1 %v202_v20  ;;  %v214_v23 = vsel %vm150_vm0, %v692_v21, 0.0 }
 0x19a   :  { %703 = vpow2.f32 %v195_v19 }
 0x19b   :  { %v694_v22 = vpop.eup %693 }
 0x19c   :  { %v199_v24 = vsel %vm150_vm0, %v694_v22, 0.0  ;;  %v858_v25 = vpop.eup %695 }
 0x19d   :  { %215 = vadd.xlane.f32.xlu1 %v214_v23  ;;  %200 = vadd.xlane.f32.xlu0 %v199_v24  ;;  %v208_v33 = vsel %vm150_vm0, %v858_v25, 0.0 }
 0x19f   :  { %v698_v32 = vpop.eup %697 }
 0x1a0   :  { %v211_v34 = vsel %vm150_vm0, %v698_v32, 0.0  ;;  %v863_v35 = vpop.eup %699 }
 0x1a1   :  { %209 = vadd.xlane.f32.xlu1 %v208_v33  ;;  %212 = vadd.xlane.f32.xlu0 %v211_v34  ;;  %v205_v38 = vsel %vm150_vm0, %v863_v35, 0.0 }
 0x1a3   :  { %v865_v36 = vpop.eup %701 }
 0x1a4   :  { %v220_v37 = vsel %vm150_vm0, %v865_v36, 0.0  ;;  %v871_v39 = vpop.eup %703 }
 0x1a5   :  { %221 = vadd.xlane.f32.xlu1 %v220_v37  ;;  %206 = vadd.xlane.f32.xlu0 %v205_v38  ;;  %v217_v40 = vsel %vm150_vm0, %v871_v39, 0.0 }
 0x1a9   :  { %218 = vadd.xlane.f32.xlu0 %v217_v40 }
 0x226   :  { %v204_v43 = vpop.xlane.xlu1 %203 }
 0x227   :  { %705 = vrcp.f32 %v204_v43 }
 0x22a   :  { %v216_v44 = vpop.xlane.xlu1 %215  ;;  %v201_v45 = vpop.xlane.xlu0 %200 }
 0x22b   :  { %707 = vrcp.f32 %v216_v44 }
 0x22c   :  { %709 = vrcp.f32 %v201_v45 }
 0x22e   :  { %v213_v49 = vpop.xlane.xlu0 %212  ;;  %v210_v56 = vpop.xlane.xlu1 %209 }
 0x22f   :  { %711 = vrcp.f32 %v213_v49 }
 0x230   :  { %713 = vrcp.f32 %v210_v56 }
 0x231   :  { %v706_v46 = vpop.eup %705 }
 0x232   :  { %v232_v47 = vmul.f32 %v706_v46, %v690_v18  ;;  %v207_v58 = vpop.xlane.xlu0 %206  ;;  %v222_v59 = vpop.xlane.xlu1 %221 }
 0x233   :  { %715 = vrcp.f32 %v222_v59 }
 0x234   :  { %246 = vperm.xlu1 %664, %v232_v47   ;;  %292 = vperm.xlu0 %665, %v232_v47  }
 0x235   :  { %v708_v48 = vpop.eup %707 }
 0x236   :  { %v236_v50 = vmul.f32 %v708_v48, %v692_v21  ;;  %v710_v53 = vpop.eup %709  ;;  %v219_v60 = vpop.xlane.xlu0 %218 }
 0x237   :  { %v231_v54 = vmul.f32 %v710_v53, %v694_v22  ;;  %717 = vrcp.f32 %v219_v60 }
 0x238   :  { %266 = vperm.xlu1 %664, %v236_v50   ;;  %668 = vset.pattern.permute.xlu0 %v723_v51  ;;  %719 = vrcp.f32 %v207_v58 }
 0x239   :  { %388 = vperm.xlu0 %668, %v236_v50   ;;  %v712_v55 = vpop.eup %711 }
 0x23a   :  { %v235_v57 = vmul.f32 %v712_v55, %v698_v32  ;;  %v714_v61 = vpop.eup %713 }
 0x23b   :  { %v234_v62 = vmul.f32 %v714_v61, %v858_v25 }
 0x23c   :  { %666 = vset.pattern.permute.xlu1 %v721_v41 }
 0x23d   :  { %308 = vperm.xlu1 %666, %v236_v50   ;;  %669 = vset.pattern.permute.xlu0 %v724_v52  ;;  %v716_v63 = vpop.eup %715 }
 0x23e   :  { %452 = vperm.xlu0 %669, %v232_v47   ;;  %v238_v0 = vmul.f32 %v716_v63, %v865_v36 }
 0x241   :  { %667 = vset.pattern.permute.xlu1 %v723_v51  ;;  %v718_v1 = vpop.eup %717 }
 0x242   :  { %372 = vperm.xlu1 %667, %v232_v47   ;;  %671 = vset.pattern.permute.xlu0 %v722_v42  ;;  %v237_v2 = vmul.f32 %v718_v1, %v871_v39  ;;  %v720_v3 = vpop.eup %719 }
 0x243   :  { %241 = vperm.xlu0 %671, %v231_v54   ;;  %v233_v4 = vmul.f32 %v720_v3, %v863_v35 }
 0x246   :  { %670 = vset.pattern.permute.xlu1 %v724_v52 }
 0x247   :  { %468 = vperm.xlu1 %670, %v236_v50   ;;  %674 = vset.pattern.permute.xlu0 %v721_v41 }
 0x248   :  { %304 = vperm.xlu0 %674, %v235_v57  }
 0x24b   :  { %672 = vset.pattern.permute.xlu1 %v722_v42 }
 0x24c   :  { %675 = vset.pattern.permute.xlu0 %v723_v51  ;;  %261 = vperm.xlu1 %672, %v235_v57  }
 0x24d   :  { %368 = vperm.xlu0 %675, %v231_v54  }
 0x250   :  { %673 = vset.pattern.permute.xlu1 %v721_v41 }
 0x251   :  { %678 = vset.pattern.permute.xlu0 %v724_v52  ;;  %288 = vperm.xlu1 %673, %v231_v54  }
 0x252   :  { %464 = vperm.xlu0 %678, %v235_v57  }
 0x255   :  { %676 = vset.pattern.permute.xlu1 %v723_v51 }
 0x256   :  { %681 = vset.pattern.permute.xlu0 %v723_v51  ;;  %384 = vperm.xlu1 %676, %v235_v57  }
 0x257   :  { %380 = vperm.xlu0 %681, %v234_v62  }
 0x25a   :  { %677 = vset.pattern.permute.xlu1 %v724_v52 }
 0x25b   :  { %396 = vperm.xlu0 %681, %v238_v0   ;;  %448 = vperm.xlu1 %677, %v231_v54  }
 0x25f   :  { %685 = vset.pattern.permute.xlu0 %v721_v41  ;;  %679 = vset.pattern.permute.xlu1 %v722_v42 }
 0x260   :  { %256 = vperm.xlu1 %679, %v234_v62   ;;  %312 = vperm.xlu0 %685, %v237_v2  }
 0x264   :  { %276 = vperm.xlu1 %679, %v238_v0   ;;  %688 = vset.pattern.permute.xlu0 %v724_v52 }
 0x265   :  { %472 = vperm.xlu0 %688, %v237_v2  }
 0x268   :  { %680 = vset.pattern.permute.xlu1 %v721_v41 }
 0x269   :  { %300 = vperm.xlu1 %680, %v234_v62  }
 0x26d   :  { %316 = vperm.xlu1 %680, %v238_v0  }
 0x271   :  { %682 = vset.pattern.permute.xlu1 %v724_v52 }
 0x272   :  { %460 = vperm.xlu1 %682, %v234_v62  }
 0x276   :  { %683 = vset.pattern.permute.xlu1 %v722_v42 }
 0x277   :  { %251 = vperm.xlu1 %683, %v233_v4  }
 0x27b   :  { %271 = vperm.xlu1 %683, %v237_v2  }
 0x27f   :  { %684 = vset.pattern.permute.xlu1 %v721_v41 }
 0x280   :  { %296 = vperm.xlu1 %684, %v233_v4  }
 0x284   :  { %686 = vset.pattern.permute.xlu1 %v723_v51 }
 0x285   :  { %376 = vperm.xlu1 %686, %v233_v4  }
 0x289   :  { %392 = vperm.xlu1 %686, %v237_v2  }
 0x28d   :  { %687 = vset.pattern.permute.xlu1 %v724_v52 }
 0x28e   :  { %456 = vperm.xlu1 %687, %v233_v4  }
 0x292   :  { %476 = vperm.xlu1 %687, %v238_v0  }
 0x2b3   :  { %v904_v5 = vpop.permute.xlu1 %246  ;;  %v293_v6 = vpop.permute.xlu0 %292 }
 0x2b4   :  { %v320_v7 = vmul.f32 %v293_v6, %v811_v26 }
 0x2b6   :  { %337 = vrot.lane.b32.xlu1 %v320_v7, %s725_s0 }
 0x2b7   :  { %v908_v8 = vpop.permute.xlu1 %266 }
 0x2b8   :  { %v389_v13 = vpop.permute.xlu0 %388 }
 0x2b9   :  { %v404_v17 = vmul.f32 %v389_v13, %v816_v27 }
 0x2bc   :  { %v309_v11 = vpop.permute.xlu1 %308 }
 0x2bd   :  { %v324_v12 = vmul.f32 %v309_v11, %v816_v27  ;;  %v453_v16 = vpop.permute.xlu0 %452 }
 0x2be   :  { %v480_v19 = vmul.f32 %v453_v16, %v811_v26 }
 0x2bf   :  { %345 = vrot.lane.b32.xlu1 %v324_v12, %s725_s0  ;;  %v280_v12 = vmul.f32 %v904_v5, %v811_v26 }
 0x2c1   :  { %v373_v14 = vpop.permute.xlu1 %372 }
 0x2c2   :  { %v400_v15 = vmul.f32 %v373_v14, %v811_v26  ;;  %v917_v20 = vpop.permute.xlu0 %241 }
 0x2c4   :  { %417 = vrot.lane.b32.xlu1 %v400_v15, %s726_s2  ;;  %v284_v15 = vmul.f32 %v908_v8, %v816_v27  ;;  %v279_v8 = vmul.f32 %v917_v20, %v769_v9 }
 0x2c6   :  { %v469_v18 = vpop.permute.xlu1 %468 }
 0x2c7   :  { %v484_v22 = vmul.f32 %v469_v18, %v816_v27  ;;  %v305_v23 = vpop.permute.xlu0 %304 }
 0x2c8   :  { %425 = vrot.lane.b32.xlu1 %v404_v17, %s726_s2  ;;  %v323_v32 = vmul.f32 %v305_v23, %v774_v10 }
 0x2cb   :  { %v919_v21 = vpop.permute.xlu1 %261 }
 0x2cc   :  { %497 = vrot.lane.b32.xlu1 %v480_v19, %s727_s7  ;;  %v369_v34 = vpop.permute.xlu0 %368 }
 0x2cd   :  { %v399_v35 = vmul.f32 %v369_v34, %v769_v9 }
 0x2d0   :  { %v289_v24 = vpop.permute.xlu1 %288  ;;  %505 = vrot.lane.b32.xlu1 %v484_v22, %s727_s7 }
 0x2d1   :  { %v319_v25 = vmul.f32 %v289_v24, %v769_v9  ;;  %v465_v40 = vpop.permute.xlu0 %464 }
 0x2d2   :  { %v483_v42 = vmul.f32 %v465_v40, %v774_v10 }
 0x2d3   :  { %335 = vrot.lane.b32.xlu0 %v319_v25, %s725_s0 }
 0x2d5   :  { %v385_v33 = vpop.permute.xlu1 %384 }
 0x2d6   :  { %v403_v37 = vmul.f32 %v385_v33, %v774_v10  ;;  %v381_v45 = vpop.permute.xlu0 %380  ;;  %v283_v33 = vmul.f32 %v919_v21, %v774_v10 }
 0x2d7   :  { %343 = vrot.lane.b32.xlu0 %v323_v32, %s725_s0  ;;  %v402_v48 = vmul.f32 %v381_v45, %v834_v30 }
 0x2da   :  { %v449_v36 = vpop.permute.xlu1 %448  ;;  %v397_v50 = vpop.permute.xlu0 %396 }
 0x2db   :  { %415 = vrot.lane.b32.xlu0 %v399_v35, %s726_s2  ;;  %v479_v39 = vmul.f32 %v449_v36, %v769_v9  ;;  %v406_v51 = vmul.f32 %v397_v50, %v840_v31 }
 0x2df   :  { %v931_v38 = vpop.permute.xlu1 %256  ;;  %423 = vrot.lane.b32.xlu0 %v403_v37, %s726_s2  ;;  %v313_v57 = vpop.permute.xlu0 %312 }
 0x2e0   :  { %v325_v58 = vmul.f32 %v313_v57, %v826_v29  ;;  %v282_v21 = vmul.f32 %v931_v38, %v834_v30 }
 0x2e3   :  { %v935_v41 = vpop.permute.xlu1 %276  ;;  %495 = vrot.lane.b32.xlu0 %v479_v39, %s727_s7 }
 0x2e4   :  { %v473_v1 = vpop.permute.xlu0 %472 }
 0x2e5   :  { %v485_v4 = vmul.f32 %v473_v1, %v826_v29 }
 0x2e7   :  { %503 = vrot.lane.b32.xlu0 %v483_v42, %s727_s7 }
 0x2e8   :  { %v301_v43 = vpop.permute.xlu1 %300 }
 0x2e9   :  { %v322_v44 = vmul.f32 %v301_v43, %v834_v30 }
 0x2eb   :  { %341 = vrot.lane.b32.xlu1 %v322_v44, %s725_s0 }
 0x2ec   :  { %v317_v46 = vpop.permute.xlu1 %316 }
 0x2ed   :  { %v326_v47 = vmul.f32 %v317_v46, %v840_v31 }
 0x2ef   :  { %349 = vrot.lane.b32.xlu1 %v326_v47, %s725_s0 }
 0x2f1   :  { %v461_v49 = vpop.permute.xlu1 %460 }
 0x2f2   :  { %v482_v53 = vmul.f32 %v461_v49, %v834_v30  ;;  %v286_v30 = vmul.f32 %v935_v41, %v840_v31 }
 0x2f3   :  { %421 = vrot.lane.b32.xlu1 %v402_v48, %s726_s2 }
 0x2f6   :  { %v947_v52 = vpop.permute.xlu1 %251 }
 0x2f7   :  { %429 = vrot.lane.b32.xlu1 %v406_v51, %s726_s2  ;;  %v281_v51 = vmul.f32 %v947_v52, %v821_v28 }
 0x2fa   :  { %v951_v54 = vpop.permute.xlu1 %271 }
 0x2fb   :  { %501 = vrot.lane.b32.xlu1 %v482_v53, %s727_s7 }
 0x2ff   :  { %v297_v55 = vpop.permute.xlu1 %296 }
 0x300   :  { %v321_v56 = vmul.f32 %v297_v55, %v821_v28  ;;  %v285_v55 = vmul.f32 %v951_v54, %v826_v29 }
 0x302   :  { %339 = vrot.lane.b32.xlu0 %v321_v56, %s725_s0 }
 0x304   :  { %v377_v59 = vpop.permute.xlu1 %376 }
 0x305   :  { %v401_v60 = vmul.f32 %v377_v59, %v821_v28 }
 0x306   :  { %347 = vrot.lane.b32.xlu0 %v325_v58, %s725_s0 }
 0x308   :  { %v393_v61 = vpop.permute.xlu1 %392 }
 0x309   :  { %v405_v62 = vmul.f32 %v393_v61, %v826_v29 }
 0x30a   :  { %419 = vrot.lane.b32.xlu0 %v401_v60, %s726_s2 }
 0x30d   :  { %v457_v63 = vpop.permute.xlu1 %456 }
 0x30e   :  { %427 = vrot.lane.b32.xlu0 %v405_v62, %s726_s2  ;;  %v481_v0 = vmul.f32 %v457_v63, %v821_v28 }
 0x311   :  { %v477_v2 = vpop.permute.xlu1 %476 }
 0x312   :  { %v486_v3 = vmul.f32 %v477_v2, %v840_v31  ;;  %499 = vrot.lane.b32.xlu0 %v481_v0, %s727_s7 }
 0x314   :  { %509 = vrot.lane.b32.xlu1 %v486_v3, %s727_s7 }
 0x316   :  { %507 = vrot.lane.b32.xlu0 %v485_v4, %s727_s7 }
 0x328   :  { %v338_v6 = vpop.permute.xlu1 %337 }
 0x329   :  { %v360_v14 = vadd.f32 %v338_v6, %v280_v12 }
 0x331   :  { %v346_v7 = vpop.permute.xlu1 %345 }
 0x332   :  { %v364_v18 = vadd.f32 %v346_v7, %v284_v15 }
 0x336   :  { %v418_v11 = vpop.permute.xlu1 %417 }
 0x337   :  { %v440_v16 = vadd.f32 %v418_v11, %v360_v14 }
 0x33a   :  { %v426_v13 = vpop.permute.xlu1 %425 }
 0x33b   :  { %v444_v22 = vadd.f32 %v426_v13, %v364_v18 }
 0x33e   :  { %v498_v17 = vpop.permute.xlu1 %497 }
 0x33f   :  { %v520_v19 = vadd.f32 %v498_v17, %v440_v16 }
 0x341   :  { %529 = vst.msk [vmem:[%s1019_s3 + $0x8] sm:$0xff] %vm527_vm1, %v520_v19 }
 0x342   :  { %v506_v23 = vpop.permute.xlu1 %505 }
 0x343   :  { %v524_v24 = vadd.f32 %v506_v23, %v444_v22 }
 0x345   :  { %533 = vst.msk [vmem:[%s1019_s3 + $0x28] sm:$0xff] %vm527_vm1, %v524_v24  ;;  %v336_v26 = vpop.permute.xlu0 %335 }
 0x346   :  { %v359_v32 = vadd.f32 %v336_v26, %v279_v8 }
 0x349   :  { %v344_v27 = vpop.permute.xlu0 %343 }
 0x34a   :  { %v363_v36 = vadd.f32 %v344_v27, %v283_v33 }
 0x34d   :  { %v416_v5 = vpop.permute.xlu0 %415 }
 0x34e   :  { %v439_v34 = vadd.f32 %v416_v5, %v359_v32 }
 0x351   :  { %v424_v25 = vpop.permute.xlu0 %423 }
 0x352   :  { %v443_v39 = vadd.f32 %v424_v25, %v363_v36 }
 0x355   :  { %v496_v35 = vpop.permute.xlu0 %495 }
 0x356   :  { %v519_v37 = vadd.f32 %v496_v35, %v439_v34 }
 0x358   :  { %528 = vst.msk [vmem:[%s1019_s3] sm:$0xff] %vm527_vm1, %v519_v37 }
 0x359   :  { %v504_v40 = vpop.permute.xlu0 %503 }
 0x35a   :  { %v523_v42 = vadd.f32 %v504_v40, %v443_v39 }
 0x35c   :  { %532 = vst.msk [vmem:[%s1019_s3 + $0x20] sm:$0xff] %vm527_vm1, %v523_v42 }
 0x35d   :  { %v342_v9 = vpop.permute.xlu1 %341 }
 0x35e   :  { %v362_v44 = vadd.f32 %v342_v9, %v282_v21 }
 0x361   :  { %v350_v20 = vpop.permute.xlu1 %349 }
 0x362   :  { %v366_v56 = vadd.f32 %v350_v20, %v286_v30 }
 0x365   :  { %v422_v10 = vpop.permute.xlu1 %421 }
 0x366   :  { %v442_v45 = vadd.f32 %v422_v10, %v362_v44 }
 0x369   :  { %v430_v43 = vpop.permute.xlu1 %429 }
 0x36a   :  { %v446_v59 = vadd.f32 %v430_v43, %v366_v56 }
 0x36d   :  { %v502_v46 = vpop.permute.xlu1 %501 }
 0x36e   :  { %v522_v47 = vadd.f32 %v502_v46, %v442_v45 }
 0x370   :  { %531 = vst.msk [vmem:[%s1019_s3 + $0x18] sm:$0xff] %vm527_vm1, %v522_v47 }
 0x374   :  { %v340_v48 = vpop.permute.xlu0 %339 }
 0x375   :  { %v361_v38 = vadd.f32 %v340_v48, %v281_v51 }
 0x378   :  { %v348_v49 = vpop.permute.xlu0 %347 }
 0x379   :  { %v365_v60 = vadd.f32 %v348_v49, %v285_v55 }
 0x37c   :  { %v420_v50 = vpop.permute.xlu0 %419 }
 0x37d   :  { %v441_v57 = vadd.f32 %v420_v50, %v361_v38 }
 0x380   :  { %v428_v53 = vpop.permute.xlu0 %427 }
 0x381   :  { %v445_v63 = vadd.f32 %v428_v53, %v365_v60 }
 0x384   :  { %v500_v58 = vpop.permute.xlu0 %499 }
 0x385   :  { %v521_v61 = vadd.f32 %v500_v58, %v441_v57 }
 0x386   :  { %v510_v62 = vpop.permute.xlu1 %509 }
 0x387   :  { %530 = vst.msk [vmem:[%s1019_s3 + $0x10] sm:$0xff] %vm527_vm1, %v521_v61  ;;  %v526_v28 = vadd.f32 %v510_v62, %v446_v59 }
 0x388   :  { %v508_v52 = vpop.permute.xlu0 %507 }
 0x389   :  { %535 = vst.msk [vmem:[%s1019_s3 + $0x38] sm:$0xff] %vm527_vm1, %v526_v28  ;;  %v525_v29 = vadd.f32 %v508_v52, %v445_v63 }
 0x38b   :  { %534 = vst.msk [vmem:[%s1019_s3 + $0x30] sm:$0xff] %vm527_vm1, %v525_v29 }

</bundles_post_ra>
